<compile_context>
chip_gen: v7x
topology: tpu7x:2x2x1
jax: 0.10.0
libtpu: 0.0.40
codegen_flags: <defaults>
</compile_context>

<pallas_src>
import functools

import jax
import jax.numpy as jnp
from jax.experimental import pallas as pl
from jax.experimental.pallas import tpu as pltpu


def _rmsnorm_kernel(x_ref, o_ref, *, eps: float):
    # x_ref / o_ref: (row_tile, dim) tiles in VMEM.
    # Pass 1: sum of squares in f32; the upcast is consumed by the reduction.
    xf = x_ref[...].astype(jnp.float32)
    ms = jnp.mean(xf * xf, axis=-1, keepdims=True)          # (row_tile, 1)
    inv = jax.lax.rsqrt(ms + eps)                            # rsqrt on EUP
    # Pass 2: re-read the VMEM tile instead of keeping the f32 copy live.
    o_ref[...] = (x_ref[...].astype(jnp.float32) * inv).astype(o_ref.dtype)


def _sublane_multiple(dtype) -> int:
    # Native packed-tile sublane multiple per element width.
    itemsize = jnp.dtype(dtype).itemsize
    return {4: 8, 2: 16, 1: 32}.get(itemsize, 8)


def _pick_row_tile(rows: int, dim: int, dtype, target_tile_bytes: int = 2 << 20) -> int:
    """Largest dtype-aligned row tile moving ~target_tile_bytes per step."""
    align = _sublane_multiple(dtype)
    bytes_per_row = max(1, dim * jnp.dtype(dtype).itemsize)
    tile = max(1, target_tile_bytes // bytes_per_row)
    tile = min(tile, 1024)                       # keep double-buffered footprint modest
    tile = max(align, (tile // align) * align)   # round down to alignment
    if tile > rows:
        # Small inputs: one tile covering all rows, padded up to alignment.
        tile = ((rows + align - 1) // align) * align
    return tile


def simple_rms_norm(x: jax.Array, eps: float = 1e-6, row_tile: int | None = None) -> jax.Array:
    """Pallas TPU implementation of SimpleRMSNorm.forward."""
    orig_shape = x.shape
    dim = orig_shape[-1]
    rows = 1
    for s in orig_shape[:-1]:
        rows *= s
    x2d = x.reshape(rows, dim)

    itemsize = jnp.dtype(x.dtype).itemsize
    align = _sublane_multiple(x.dtype)
    if row_tile is None:
        row_tile = _pick_row_tile(rows, dim, x.dtype)
    else:
        row_tile = max(align, (row_tile // align) * align)

    # Pad rows up to a tile multiple so the grid pipelines cleanly for any shape.
    padded_rows = pl.cdiv(rows, row_tile) * row_tile
    if padded_rows != rows:
        x2d = jnp.pad(x2d, ((0, padded_rows - rows), (0, 0)))

    grid = (padded_rows // row_tile,)

    # VMEM budget: double-buffered input + output tiles plus f32 working set,
    # with headroom; capped so it also fits v7x's 64 MiB physical VMEM.
    tile_bytes = row_tile * dim * itemsize
    f32_tile_bytes = row_tile * dim * 4
    vmem_limit = 4 * tile_bytes + 2 * f32_tile_bytes + (4 << 20)
    vmem_limit = int(min(vmem_limit, 40 << 20))

    cost = pl.CostEstimate(
        flops=3 * rows * dim,
        transcendentals=rows,
        bytes_accessed=2 * rows * dim * itemsize,
    )

    # TODO(synk): for dim < 128 (like the dim=32 test shape) the lane axis is
    # underutilized and output stores are masked; real hidden sizes (multiple
    # of 128) are lane-dense. A folded/transposed layout for tiny dims is not
    # implemented here.
    out = pl.pallas_call(
        functools.partial(_rmsnorm_kernel, eps=eps),
        out_shape=jax.ShapeDtypeStruct((padded_rows, dim), x.dtype),
        grid_spec=pltpu.PrefetchScalarGridSpec(
            num_scalar_prefetch=0,
            grid=grid,
            in_specs=[pl.BlockSpec((row_tile, dim), lambda i: (i, 0))],
            out_specs=pl.BlockSpec((row_tile, dim), lambda i: (i, 0)),
        ),
        compiler_params=pltpu.CompilerParams(
            dimension_semantics=("parallel",),
            vmem_limit_bytes=vmem_limit,
        ),
        cost_estimate=cost,
    )(x2d)

    if padded_rows != rows:
        out = out[:rows]
    return out.reshape(orig_shape)


def _reference(x: jax.Array, eps: float = 1e-6) -> jax.Array:
    xf = x.astype(jnp.float32)
    inv = jax.lax.rsqrt(jnp.mean(xf * xf, axis=-1, keepdims=True) + eps)
    return (xf * inv).astype(x.dtype)


if __name__ == "__main__":
    key = jax.random.PRNGKey(0)
    batch, seq, hidden = 2, 8, 32
    x = jax.random.normal(key, (batch, seq, hidden), dtype=jnp.float32).astype(
        jnp.bfloat16
    )

    y = simple_rms_norm(x)
    jax.block_until_ready(y)

    y_ref = _reference(x)
    assert y.shape == x.shape and y.dtype == x.dtype
    err = jnp.max(jnp.abs(y.astype(jnp.float32) - y_ref.astype(jnp.float32)))
    assert float(err) < 1e-2, f"max abs err {err}"

    # Also exercise a larger, non-divisible-row shape to validate the padded path.
    x2 = jax.random.normal(jax.random.PRNGKey(1), (3, 37, 256), dtype=jnp.float32)
    y2 = simple_rms_norm(x2)
    jax.block_until_ready(y2)
    err2 = jnp.max(jnp.abs(y2 - _reference(x2)))
    assert float(err2) < 1e-4, f"max abs err (large) {err2}"

    print("KERNEL_OK")
</pallas_src>

<mosaic_0001>
module attributes {stable_mosaic.version = 11 : i64} {
  func.func @_rmsnorm_kernel(%arg0: i32, %arg1: memref<16x32xbf16, #tpu.memory_space<vmem>>, %arg2: memref<16x32xbf16, #tpu.memory_space<vmem>>) attributes {dimension_semantics = [#tpu.dimension_semantics<parallel>], iteration_bounds = array<i64: 1>, scalar_prefetch = 0 : i64, scratch_operands = 0 : i64, tpu.core_type = #tpu.core_type<tc>, window_params = [{transform_indices = @transform_0, window_bounds = array<i64: 16, 32>}, {transform_indices = @transform_1, window_bounds = array<i64: 16, 32>}]} {
    %c0 = arith.constant 0 : index
    %c0_0 = arith.constant 0 : index
    %0 = vector.load %arg1[%c0, %c0_0] : memref<16x32xbf16, #tpu.memory_space<vmem>>, vector<16x32xbf16>
    %1 = arith.extf %0 : vector<16x32xbf16> to vector<16x32xf32>
    %2 = arith.mulf %1, %1 : vector<16x32xf32>
    %cst = arith.constant dense<0.000000e+00> : vector<16xf32>
    %3 = vector.multi_reduction <add>, %2, %cst [1] : vector<16x32xf32> to vector<16xf32>
    %4 = vector.shape_cast %3 : vector<16xf32> to vector<16x1xf32>
    %cst_1 = arith.constant 3.200000e+01 : f32
    %5 = vector.broadcast %cst_1 : f32 to vector<16x1xf32>
    %6 = arith.divf %4, %5 : vector<16x1xf32>
    %cst_2 = arith.constant 9.99999997E-7 : f32
    %7 = vector.broadcast %cst_2 : f32 to vector<16x1xf32>
    %8 = arith.addf %6, %7 : vector<16x1xf32>
    %9 = math.rsqrt %8 : vector<16x1xf32>
    %c0_3 = arith.constant 0 : index
    %c0_4 = arith.constant 0 : index
    %10 = vector.load %arg1[%c0_3, %c0_4] : memref<16x32xbf16, #tpu.memory_space<vmem>>, vector<16x32xbf16>
    %11 = arith.extf %10 : vector<16x32xbf16> to vector<16x32xf32>
    %12 = vector.broadcast %9 : vector<16x1xf32> to vector<16x32xf32>
    %13 = arith.mulf %11, %12 : vector<16x32xf32>
    %14 = arith.truncf %13 : vector<16x32xf32> to vector<16x32xbf16>
    %c0_5 = arith.constant 0 : index
    %c0_6 = arith.constant 0 : index
    %15 = vector.load %arg2[%c0_5, %c0_6] : memref<16x32xbf16, #tpu.memory_space<vmem>>, vector<16x32xbf16>
    tpu.vector_store %arg2[%c0_5, %c0_6], %14 {strides = array<i32>} : memref<16x32xbf16, #tpu.memory_space<vmem>>, vector<16x32xbf16>,
    return
  }
  func.func @transform_0(%arg0: i32) -> (i32, i32) {
    %c0_i32 = arith.constant 0 : i32
    %c0_i32_0 = arith.constant 0 : i32
    return %arg0, %c0_i32 : i32, i32
  }
  func.func @transform_1(%arg0: i32) -> (i32, i32) {
    %c0_i32 = arith.constant 0 : i32
    %c0_i32_0 = arith.constant 0 : i32
    return %arg0, %c0_i32 : i32, i32
  }
}

</mosaic_0001>

<bundles_post_ra>
// kernel: tpu_custom_call.1
= control target key start
LH: loop header
LB: loop body
LE: loop exit
PB: predicated region body
PF: predicated region fallthrough
CT: control target
= control target key end

     0   :  { %6 = vsyncpa [#allocation3], 0  ;;  %s181_s0 = inlined_call_operand.hbm [shape: bf16[16,32], index: 0, kind: input, shape index: {}]   ;;  %s182_s1 = inlined_call_operand.hbm [shape: bf16[16,32], index: 1, kind: output, shape index: {}]  }
   0x1   :  { %7 = vsyncpa [#allocation4], 0  ;;  %s137_s6 = smov [#allocation2]   ;;  %s89_s10 = scalar_lea.hbm %s181_s0, 128 }
   0x2   :  { %s13_s7 = sshll.u32 %s137_s6, 4  ;;  %p90_p0 = scmp.ne.s32.totalorder %s181_s0, %s89_s10  ;;  %s14_s7 = int_to_ptr.vmem [resolvable:$true] %s13_s7 }
   0x3   :  { %p93_p1 = scmp.lt.u32.totalorder %s89_s10, %s181_s0 }
   0x5   :  { %p95_p2 = pnand %p93_p1, %p90_p0 }
   0x7   :  { %98 = shalt.err (!%p95_p2)
}
   0x8   :  { %s99_s15 = scalar_lea.vmem %s14_s7, 128  ;;  %p104_p4 = scmp.lt.s32.totalorder %s14_s7, %s14_s7 }
   0x9   :  { %p100_p3 = scmp.ne.s32.totalorder %s14_s7, %s99_s15  ;;  %p105_p5 = scmp.lt.s32.totalorder %s99_s15, %s99_s15 }
   0xb   :  { %p106_p6 = por %p105_p5, %p104_p4 }
   0xd   :  { %p107_p7 = pnand %p106_p6, %p100_p3 }
   0xf   :  { %110 = shalt.err (!%p107_p7)
}
  0x10   :  { %s138_s16 = smov 64   ;;  %s139_s17 = smov 4  }
  0x11   :  { %19 = dma.hbm_to_vmem [thread:$0]  %s181_s0, 128, %s14_s7, [#allocation3], %s138_s16, %s138_s16, %s139_s17  }
  0x12   :  { %133 = dma.done.wait [#allocation3], 128  }
  0x13   :  { %134 = vsyncadd [#allocation3], 4294967168  ;;  %v78_v0 = vld [vmem:[#allocation2] sm:$0xff]   ;;  %vm29_vm0 = vcmask 261120   ;;  %vm53_vm1 = vcmask 257024   ;;  %s140_s0 = smov [#allocation5]  }
  0x14   :  { %v79_v1 = vunpack.c.l.bf16 %v78_v0  ;;  %v80_v2 = vunpack.c.h.bf16 %v78_v0  ;;  %s61_s20 = sshll.u32 %s140_s0, 4  ;;  %s62_s20 = int_to_ptr.vmem [resolvable:$true] %s61_s20 }
  0x15   :  { %s111_s21 = scalar_lea.vmem %s62_s20, 128  ;;  %p116_p9 = scmp.lt.s32.totalorder %s62_s20, %s62_s20 }
  0x16   :  { %v27_v3 = vmul.f32 %v79_v1, %v79_v1  ;;  %v28_v4 = vmul.f32 %v80_v2, %v80_v2  ;;  %p112_p8 = scmp.ne.s32.totalorder %s62_s20, %s111_s21  ;;  %p117_p10 = scmp.lt.s32.totalorder %s111_s21, %s111_s21 }
  0x18   :  { %v30_v5 = vsel %vm29_vm0, %v27_v3, 0.0  ;;  %v33_v6 = vsel %vm29_vm0, %v28_v4, 0.0  ;;  %p118_p11 = por %p117_p10, %p116_p9 }
  0x19   :  { %31 = vadd.xlane.f32.xlu0 %v30_v5 }
  0x1a   :  { %p119_p12 = pnand %p118_p11, %p112_p8 }
  0x1d   :  { %34 = vadd.xlane.f32.xlu0 %v33_v6 }
  0xa6   :  { %v32_v7 = vpop.xlane.xlu0 %31 }
  0xa7   :  { %v37_v8 = vmul.f32 0.03125, %v32_v7 }
  0xa9   :  { %v39_v9 = vadd.f32 1e-06, %v37_v8 }
  0xaa   :  { %v35_v10 = vpop.xlane.xlu0 %34 }
  0xab   :  { %85 = vrsqrt.f32 %v39_v9  ;;  %v38_v11 = vmul.f32 0.03125, %v35_v10 }
  0xad   :  { %v40_v12 = vadd.f32 1e-06, %v38_v11 }
  0xaf   :  { %87 = vrsqrt.f32 %v40_v12 }
  0xb5   :  { %v86_v13 = vpop.eup %85 }
  0xb6   :  { %v43_v14 = vmul.f32 %v86_v13, %v79_v1 }
  0xb8   :  { %v75_v15 = vpack.c.bf16 %v43_v14, %v43_v14 }
  0xb9   :  { %v88_v16 = vpop.eup %87 }
  0xba   :  { %v44_v17 = vmul.f32 %v88_v16, %v80_v2  ;;  %54 = vst.msk [vmem:[#allocation5] sm:$0xf] %vm53_vm1, %v75_v15 }
  0xbc   :  { %v76_v18 = vpack.c.bf16 %v44_v17, %v44_v17 }
  0xbe   :  { %55 = vst.msk [vmem:[#allocation5 + $0x4] sm:$0xf] %vm53_vm1, %v76_v18 }
  0xbf   :  { %122 = shalt.err (!%p119_p12)
}
  0xc0   :  { %s123_s24 = scalar_lea.hbm %s182_s1, 128 }
  0xc1   :  { %p124_p13 = scmp.ne.s32.totalorder %s182_s1, %s123_s24  ;;  %p127_p0 = scmp.lt.u32.totalorder %s123_s24, %s182_s1 }
  0xc3   :  { %p129_p1 = pnand %p127_p0, %p124_p13 }
  0xc5   :  { %132 = shalt.err (!%p129_p1)
}
  0xc6   :  { %67 = dma.vmem_to_hbm [thread:$0]  %s62_s20, 128, %s182_s1, [#allocation4], %s138_s16, %s138_s16, %s139_s17  }
  0xc7   :  { %135 = dma.done.wait [#allocation4], 128  }
  0xc8   :  { %136 = vsyncadd [#allocation4], 4294967168 }
  0xc9   :  { %71 = vsyncpa [#allocation3], 1 }
  0xca   :  { %72 = vsyncpa [#allocation4], 1 }

</bundles_post_ra>
